<compile_context>
chip_gen: v7x
topology: tpu7x:2x2x1
jax: 0.10.0
libtpu: 0.0.40
codegen_flags: <defaults>
</compile_context>

<pallas_src>
import functools

import jax
import jax.numpy as jnp
from jax.experimental import pallas as pl
from jax.experimental.pallas import tpu as pltpu


# ------------------------- fused Conv + IN + ReLU kernel ------------------------- #

def _conv_in_relu_kernel(p_ref, w_ref, o_ref):
    # p_ref: (1, K, HW)   bf16  im2col patches for one sample (K = Cin*k*k)
    # w_ref: (Cout, K)    bf16  flattened conv weight (replicated across the grid)
    # o_ref: (1, Cout, HW) f32  InstanceNorm+ReLU'd conv output, HW on lanes
    y = jnp.dot(w_ref[...], p_ref[0],
                preferred_element_type=jnp.float32)            # MXU, f32 accumulate
    # InstanceNorm2d(affine=False, eps=1e-5, biased variance) — reduction over lanes.
    mean = jnp.mean(y, axis=-1, keepdims=True)
    yc = y - mean
    var = jnp.mean(yc * yc, axis=-1, keepdims=True)
    o_ref[0] = jnp.maximum(yc * jax.lax.rsqrt(var + 1e-5), 0.0)  # ReLU


def fused_conv_in_relu(x_pad, w, stride, mxu_dtype=jnp.bfloat16):
    """x_pad: (N, Cin, Hp, Wp) f32 (already reflection-padded).
    w: PyTorch Conv2d weight (Cout, Cin, k, k).  Bias intentionally omitted: it is
    exactly cancelled by the following affine-less InstanceNorm.
    Returns (N, Cout, Hout, Wout) f32."""
    N, Cin, Hp, Wp = x_pad.shape
    Cout, Cin_w, k, _ = w.shape
    assert Cin_w == Cin
    Hout = (Hp - k) // stride + 1
    Wout = (Wp - k) // stride + 1
    HW = Hout * Wout
    K = Cin * k * k

    # im2col glue (XLA strided slices), tap ordering (c, kh, kw) to match
    # w.reshape(Cout, Cin*k*k).
    taps = []
    for kh in range(k):
        for kw in range(k):
            taps.append(
                jax.lax.slice(
                    x_pad,
                    (0, 0, kh, kw),
                    (N, Cin, kh + stride * (Hout - 1) + 1, kw + stride * (Wout - 1) + 1),
                    (1, 1, stride, stride),
                )
            )
    patches = jnp.stack(taps, axis=2)                 # (N, Cin, k*k, Hout, Wout)
    patches = patches.reshape(N, K, HW).astype(mxu_dtype)
    w_mat = w.reshape(Cout, K).astype(mxu_dtype)

    out = pl.pallas_call(
        _conv_in_relu_kernel,
        out_shape=jax.ShapeDtypeStruct((N, Cout, HW), jnp.float32),
        grid=(N,),
        in_specs=[
            pl.BlockSpec((1, K, HW), lambda n: (n, 0, 0)),   # per-sample patches
            pl.BlockSpec((Cout, K), lambda n: (0, 0)),       # replicated weight
        ],
        out_specs=pl.BlockSpec((1, Cout, HW), lambda n: (n, 0, 0)),
        compiler_params=pltpu.CompilerParams(dimension_semantics=("parallel",)),
    )(patches, w_mat)
    return out.reshape(N, Cout, Hout, Wout)


# ------------------------------- module forward --------------------------------- #

def block_2in_forward(x_nchw, params, kernel_size, stride):
    p = kernel_size // 2
    x = x_nchw.astype(jnp.float32)
    x = jnp.pad(x, ((0, 0), (0, 0), (p, p), (p, p)), mode="reflect")  # ReflectionPad2d
    x = fused_conv_in_relu(x, params["w1"], stride=1)                 # Conv2d(k, s=1)+IN+ReLU
    x = jnp.pad(x, ((0, 0), (0, 0), (p, p), (p, p)), mode="reflect")  # ReflectionPad2d
    x = fused_conv_in_relu(x, params["w2"], stride=stride)            # Conv2d(k, stride)+IN+ReLU
    return x                                                          # NCHW


def init_params(key, in_c, out_c, kernel_size):
    k1, k2, k3, k4 = jax.random.split(key, 4)
    kk = kernel_size * kernel_size
    # xavier_normal_ for Conv2d weight (out_c, in_c, k, k)
    std1 = (2.0 / (in_c * kk + out_c * kk)) ** 0.5
    w1 = std1 * jax.random.normal(k1, (out_c, in_c, kernel_size, kernel_size), jnp.float32)
    std2 = (2.0 / (out_c * kk + out_c * kk)) ** 0.5
    w2 = std2 * jax.random.normal(k2, (out_c, out_c, kernel_size, kernel_size), jnp.float32)
    # network_use_bias=True: biases exist in the module, but a constant per-channel bias
    # is exactly cancelled by the affine-less InstanceNorm that follows, so they are
    # kept as parameters and intentionally unused in the forward pass.
    b1 = 0.01 * jax.random.normal(k3, (out_c,), jnp.float32)
    b2 = 0.01 * jax.random.normal(k4, (out_c,), jnp.float32)
    return {"w1": w1, "b1": b1, "w2": w2, "b2": b2}


if __name__ == "__main__":
    in_c, out_c, kernel_size, stride = 4, 8, 3, 2
    key = jax.random.PRNGKey(0)
    kx, kp = jax.random.split(key)
    x = jax.random.normal(kx, (2, in_c, 16, 16), jnp.float32)   # NCHW like PyTorch
    params = init_params(kp, in_c, out_c, kernel_size)

    fwd = jax.jit(functools.partial(block_2in_forward,
                                    kernel_size=kernel_size, stride=stride))
    out = jax.block_until_ready(fwd(x, params))

    # (2,4,16,16) -pad-> (2,4,18,18) -conv k3 s1-> (2,8,16,16)
    # -pad-> (2,8,18,18) -conv k3 s2-> (2,8,8,8)
    assert out.shape == (2, out_c, 8, 8), out.shape
    assert bool(jnp.all(out >= 0.0))  # ReLU output
    print("KERNEL_OK")
</pallas_src>

<mosaic_0001>
module attributes {stable_mosaic.version = 11 : i64} {
  func.func @_conv_in_relu_kernel(%arg0: i32, %arg1: memref<1x36x256xbf16, #tpu.memory_space<vmem>>, %arg2: memref<8x36xbf16, #tpu.memory_space<vmem>>, %arg3: memref<1x8x256xf32, #tpu.memory_space<vmem>>) attributes {dimension_semantics = [#tpu.dimension_semantics<parallel>], iteration_bounds = array<i64: 2>, scalar_prefetch = 0 : i64, scratch_operands = 0 : i64, tpu.core_type = #tpu.core_type<tc>, window_params = [{transform_indices = @transform_0, window_bounds = array<i64: 1, 36, 256>}, {pipeline_mode = #tpu.pipeline_mode<synchronous>, transform_indices = @transform_1, window_bounds = array<i64: 8, 36>}, {transform_indices = @transform_2, window_bounds = array<i64: 1, 8, 256>}]} {
    %c0 = arith.constant 0 : index
    %c0_0 = arith.constant 0 : index
    %0 = vector.load %arg2[%c0, %c0_0] : memref<8x36xbf16, #tpu.memory_space<vmem>>, vector<8x36xbf16>
    %c0_1 = arith.constant 0 : index
    %c0_2 = arith.constant 0 : index
    %c0_3 = arith.constant 0 : index
    %1 = vector.load %arg1[%c0_1, %c0_2, %c0_3] : memref<1x36x256xbf16, #tpu.memory_space<vmem>>, vector<1x36x256xbf16>
    %2 = vector.shape_cast %1 : vector<1x36x256xbf16> to vector<36x256xbf16>
    %cst = arith.constant dense<0.000000e+00> : vector<8x256xf32>
    %3 = tpu.matmul %0, %2, %cst {dimension_numbers = #tpu.dot_dimension_numbers<[1], [0], [0], [1], [0, 0, 1, 1], [], []>} : vector<8x36xbf16>, vector<36x256xbf16>, vector<8x256xf32> -> vector<8x256xf32>
    %cst_4 = arith.constant dense<0.000000e+00> : vector<8xf32>
    %4 = vector.multi_reduction <add>, %3, %cst_4 [1] : vector<8x256xf32> to vector<8xf32>
    %5 = vector.shape_cast %4 : vector<8xf32> to vector<8x1xf32>
    %cst_5 = arith.constant 2.560000e+02 : f32
    %6 = vector.broadcast %cst_5 : f32 to vector<8x1xf32>
    %7 = arith.divf %5, %6 : vector<8x1xf32>
    %8 = vector.broadcast %7 : vector<8x1xf32> to vector<8x256xf32>
    %9 = arith.subf %3, %8 : vector<8x256xf32>
    %10 = arith.mulf %9, %9 : vector<8x256xf32>
    %cst_6 = arith.constant dense<0.000000e+00> : vector<8xf32>
    %11 = vector.multi_reduction <add>, %10, %cst_6 [1] : vector<8x256xf32> to vector<8xf32>
    %12 = vector.shape_cast %11 : vector<8xf32> to vector<8x1xf32>
    %cst_7 = arith.constant 2.560000e+02 : f32
    %13 = vector.broadcast %cst_7 : f32 to vector<8x1xf32>
    %14 = arith.divf %12, %13 : vector<8x1xf32>
    %cst_8 = arith.constant 9.99999974E-6 : f32
    %15 = vector.broadcast %cst_8 : f32 to vector<8x1xf32>
    %16 = arith.addf %14, %15 : vector<8x1xf32>
    %17 = math.rsqrt %16 : vector<8x1xf32>
    %18 = vector.broadcast %17 : vector<8x1xf32> to vector<8x256xf32>
    %19 = arith.mulf %9, %18 : vector<8x256xf32>
    %cst_9 = arith.constant 0.000000e+00 : f32
    %20 = vector.broadcast %cst_9 : f32 to vector<8x256xf32>
    %21 = arith.maximumf %19, %20 : vector<8x256xf32>
    %c0_10 = arith.constant 0 : index
    %c0_11 = arith.constant 0 : index
    %c0_12 = arith.constant 0 : index
    %22 = vector.load %arg3[%c0_10, %c0_11, %c0_12] : memref<1x8x256xf32, #tpu.memory_space<vmem>>, vector<1x8x256xf32>
    %23 = vector.shape_cast %22 : vector<1x8x256xf32> to vector<8x256xf32>
    %24 = vector.shape_cast %21 : vector<8x256xf32> to vector<1x8x256xf32>
    tpu.vector_store %arg3[%c0_10, %c0_11, %c0_12], %24 {strides = array<i32>} : memref<1x8x256xf32, #tpu.memory_space<vmem>>, vector<1x8x256xf32>,
    return
  }
  func.func @transform_0(%arg0: i32) -> (i32, i32, i32) {
    %c0_i32 = arith.constant 0 : i32
    %c0_i32_0 = arith.constant 0 : i32
    %c0_i32_1 = arith.constant 0 : i32
    return %arg0, %c0_i32, %c0_i32_0 : i32, i32, i32
  }
  func.func @transform_1(%arg0: i32) -> (i32, i32) {
    %c0_i32 = arith.constant 0 : i32
    %c0_i32_0 = arith.constant 0 : i32
    %c0_i32_1 = arith.constant 0 : i32
    return %c0_i32, %c0_i32_0 : i32, i32
  }
  func.func @transform_2(%arg0: i32) -> (i32, i32, i32) {
    %c0_i32 = arith.constant 0 : i32
    %c0_i32_0 = arith.constant 0 : i32
    %c0_i32_1 = arith.constant 0 : i32
    return %arg0, %c0_i32, %c0_i32_0 : i32, i32, i32
  }
}

module attributes {stable_mosaic.version = 11 : i64} {
  func.func @_conv_in_relu_kernel(%arg0: i32, %arg1: memref<1x72x64xbf16, #tpu.memory_space<vmem>>, %arg2: memref<8x72xbf16, #tpu.memory_space<vmem>>, %arg3: memref<1x8x64xf32, #tpu.memory_space<vmem>>) attributes {dimension_semantics = [#tpu.dimension_semantics<parallel>], iteration_bounds = array<i64: 2>, scalar_prefetch = 0 : i64, scratch_operands = 0 : i64, tpu.core_type = #tpu.core_type<tc>, window_params = [{transform_indices = @transform_0, window_bounds = array<i64: 1, 72, 64>}, {pipeline_mode = #tpu.pipeline_mode<synchronous>, transform_indices = @transform_1, window_bounds = array<i64: 8, 72>}, {transform_indices = @transform_2, window_bounds = array<i64: 1, 8, 64>}]} {
    %c0 = arith.constant 0 : index
    %c0_0 = arith.constant 0 : index
    %0 = vector.load %arg2[%c0, %c0_0] : memref<8x72xbf16, #tpu.memory_space<vmem>>, vector<8x72xbf16>
    %c0_1 = arith.constant 0 : index
    %c0_2 = arith.constant 0 : index
    %c0_3 = arith.constant 0 : index
    %1 = vector.load %arg1[%c0_1, %c0_2, %c0_3] : memref<1x72x64xbf16, #tpu.memory_space<vmem>>, vector<1x72x64xbf16>
    %2 = vector.shape_cast %1 : vector<1x72x64xbf16> to vector<72x64xbf16>
    %cst = arith.constant dense<0.000000e+00> : vector<8x64xf32>
    %3 = tpu.matmul %0, %2, %cst {dimension_numbers = #tpu.dot_dimension_numbers<[1], [0], [0], [1], [0, 0, 1, 1], [], []>} : vector<8x72xbf16>, vector<72x64xbf16>, vector<8x64xf32> -> vector<8x64xf32>
    %cst_4 = arith.constant dense<0.000000e+00> : vector<8xf32>
    %4 = vector.multi_reduction <add>, %3, %cst_4 [1] : vector<8x64xf32> to vector<8xf32>
    %5 = vector.shape_cast %4 : vector<8xf32> to vector<8x1xf32>
    %cst_5 = arith.constant 6.400000e+01 : f32
    %6 = vector.broadcast %cst_5 : f32 to vector<8x1xf32>
    %7 = arith.divf %5, %6 : vector<8x1xf32>
    %8 = vector.broadcast %7 : vector<8x1xf32> to vector<8x64xf32>
    %9 = arith.subf %3, %8 : vector<8x64xf32>
    %10 = arith.mulf %9, %9 : vector<8x64xf32>
    %cst_6 = arith.constant dense<0.000000e+00> : vector<8xf32>
    %11 = vector.multi_reduction <add>, %10, %cst_6 [1] : vector<8x64xf32> to vector<8xf32>
    %12 = vector.shape_cast %11 : vector<8xf32> to vector<8x1xf32>
    %cst_7 = arith.constant 6.400000e+01 : f32
    %13 = vector.broadcast %cst_7 : f32 to vector<8x1xf32>
    %14 = arith.divf %12, %13 : vector<8x1xf32>
    %cst_8 = arith.constant 9.99999974E-6 : f32
    %15 = vector.broadcast %cst_8 : f32 to vector<8x1xf32>
    %16 = arith.addf %14, %15 : vector<8x1xf32>
    %17 = math.rsqrt %16 : vector<8x1xf32>
    %18 = vector.broadcast %17 : vector<8x1xf32> to vector<8x64xf32>
    %19 = arith.mulf %9, %18 : vector<8x64xf32>
    %cst_9 = arith.constant 0.000000e+00 : f32
    %20 = vector.broadcast %cst_9 : f32 to vector<8x64xf32>
    %21 = arith.maximumf %19, %20 : vector<8x64xf32>
    %c0_10 = arith.constant 0 : index
    %c0_11 = arith.constant 0 : index
    %c0_12 = arith.constant 0 : index
    %22 = vector.load %arg3[%c0_10, %c0_11, %c0_12] : memref<1x8x64xf32, #tpu.memory_space<vmem>>, vector<1x8x64xf32>
    %23 = vector.shape_cast %22 : vector<1x8x64xf32> to vector<8x64xf32>
    %24 = vector.shape_cast %21 : vector<8x64xf32> to vector<1x8x64xf32>
    tpu.vector_store %arg3[%c0_10, %c0_11, %c0_12], %24 {strides = array<i32>} : memref<1x8x64xf32, #tpu.memory_space<vmem>>, vector<1x8x64xf32>,
    return
  }
  func.func @transform_0(%arg0: i32) -> (i32, i32, i32) {
    %c0_i32 = arith.constant 0 : i32
    %c0_i32_0 = arith.constant 0 : i32
    %c0_i32_1 = arith.constant 0 : i32
    return %arg0, %c0_i32, %c0_i32_0 : i32, i32, i32
  }
  func.func @transform_1(%arg0: i32) -> (i32, i32) {
    %c0_i32 = arith.constant 0 : i32
    %c0_i32_0 = arith.constant 0 : i32
    %c0_i32_1 = arith.constant 0 : i32
    return %c0_i32, %c0_i32_0 : i32, i32
  }
  func.func @transform_2(%arg0: i32) -> (i32, i32, i32) {
    %c0_i32 = arith.constant 0 : i32
    %c0_i32_0 = arith.constant 0 : i32
    %c0_i32_1 = arith.constant 0 : i32
    return %arg0, %c0_i32, %c0_i32_0 : i32, i32, i32
  }
}

</mosaic_0001>

<bundles_post_ra>
// kernel: block_2in_forward.2
= control target key start
LH: loop header
LB: loop body
LE: loop exit
PB: predicated region body
PF: predicated region fallthrough
CT: control target
= control target key end

     0   :  { %s367_s9 = smov 0   ;;  %s391_s0 = inlined_call_operand.vmem [shape: bf16[2,36,256], index: 0, kind: input, shape index: {}]   ;;  %s392_s1 = inlined_call_operand.vmem [shape: bf16[8,36], index: 1, kind: input, shape index: {}]   ;;  %s393_s2 = inlined_call_operand.vmem [shape: f32[2,8,256], index: 2, kind: output, shape index: {}]  }
   0x1 LB: > { %s304_s10 = sadd.s32 4294967295, %s349_s9   ;;  %p308_p0 = scmp.ge.s32.totalorder %s349_s9, 1  ;;  %s349_s9 = sphi %s367_s9, %s12_s9  }
   0x2   : > { %p112_p1 = scmp.lt.s32.totalorder %s349_s9, 3 }
   0x4   : > { %p113_p2 = pnand %p308_p0, %p112_p1 }
   0x5   : > { %p134_p3 = scmp.lt.s32.totalorder (!%p113_p2), %s304_s10, 1  ;;  %v351_v0 = vmov (!%p113_p2), 0   ;;  %vm180_vm0 = vcmask (!%p113_p2), 1041408   ;;  %v145_v9 = vld [vmem:[%s392_s1] sm:$0xf] (!%p113_p2)  ;;  %vm176_vm1 = vcmask (!%p113_p2), 293888  }
   0x6   : > { %116 = sbr.rel (%p113_p2) target bundleno = 557 (0x22d), region = 28  ;;  %219 = vmatprep.mubr.bf16.mxu0 (!%p113_p2), %v351_v0 }
   0xd   : > { %s395_s10 = smov (!%p134_p3, %s304_s10), 1 }
   0xe   : > { %s323_s11 = smul.u32 40, %s395_s10  ;;  %s322_s17 = sshll.u32 %s395_s10, 4 }
   0xf   : > { %s143_s20 = scalar_lea.vmem %s393_s2, %s322_s17 }
  0x10   : > { %s138_s14 = scalar_lea.vmem %s391_s0, %s323_s11 }
  0x11   : > { %v333_v1 = vld [vmem:[%s138_s14 + $0x4] ss:$8 sps:$4 sm:$0xff]   ;;  %v335_v2 = vld [vmem:[%s138_s14] ss:$8 sps:$4 sm:$0xff]   ;;  %v336_v3 = vld [vmem:[%s138_s14 + $0x14] ss:$8 sps:$4 sm:$0xff]  }
  0x12   : > { %187 = vmatprep.subr.bf16.mxu0 %v333_v1  ;;  %v150_v4 = vld [vmem:[%s138_s14 + $0x20] sm:$0x33]  ;;  %v338_v5 = vld [vmem:[%s138_s14 + $0x10] ss:$8 sps:$4 sm:$0xff]  }
  0x13   : > { %188 = vmatpush1.bf16.msra.mxu0 %v335_v2  ;;  %v317_v6 = vcombine.high %v150_v4, %v150_v4  ;;  %v316_v7 = vcombine.low %v150_v4, %v150_v4 }
  0x14   : > { %189 = vmatprep.subr.bf16.mxu0 %v336_v3 }
  0x15   : > { %v182_v8 = vsel %vm180_vm0, %v316_v7, 0 }
  0x17   : > { %190 = vmatpush1.bf16.msra.mxu0 %v338_v5 }
  0x18   : > { %318 = vmatprep.subr.msk.bf16.mxu0 %vm180_vm0, %v317_v6 }
  0x1b   : > { %192 = vmatpush1.bf16.msra.mxu0 %v182_v8 }
  0x1e   : > { %319 = vmatmul.mubr.msk.bf16.vlgmr.msra.gmra.mrb[0].mxu0 %vm176_vm1, %v145_v9 }
  0xf1   : > { %v221_v10 = vpop.f32.mrb[0].mxu0 }
  0xf2   : > { %v223_v11 = vpop.f32.mrb[1].mxu0 }
  0xf3   : > { %v225_v12 = vpop.f32.mrb[2].mxu0  ;;  %v228_v13 = vadd.f32 %v223_v11, %v221_v10 }
  0xf4   : > { %v226_v14 = vpop.f32.mrb[3].mxu0 }
  0xf5   : > { %229 = vadd.xlane.f32.xlu0 %v228_v13 }
 0x182   : > { %v230_v15 = vpop.xlane.xlu0 %229 }
 0x183   : > { %v232_v16 = vmul.f32 0.00390625, %v230_v15 }
 0x185   : > { %v233_v17 = vsub.f32 %v221_v10, %v232_v16  ;;  %v234_v18 = vsub.f32 %v223_v11, %v232_v16 }
 0x187   : > { %v235_v19 = vmul.f32 %v233_v17, %v233_v17  ;;  %v236_v20 = vmul.f32 %v234_v18, %v234_v18 }
 0x189   : > { %v237_v21 = vadd.f32 %v236_v20, %v235_v19 }
 0x18b   : > { %238 = vadd.xlane.f32.xlu0 %v237_v21 }
 0x218   : > { %v239_v22 = vpop.xlane.xlu0 %238 }
 0x219   : > { %v240_v23 = vmul.f32 0.00390625, %v239_v22 }
 0x21b   : > { %v241_v24 = vadd.f32 1e-05, %v240_v23 }
 0x21d   : > { %341 = vrsqrt.f32 %v241_v24 }
 0x227   : > { %v342_v25 = vpop.eup %341 }
 0x228   : > { %v243_v26 = vmul.f32 %v342_v25, %v233_v17  ;;  %v244_v27 = vmul.f32 %v342_v25, %v234_v18 }
 0x22a   : > { %v245_v28 = vmax.f32 %v243_v26, 0.0  ;;  %v246_v29 = vmax.f32 %v244_v27, 0.0 }
 0x22c   : > { %247 = vst [vmem:[%s143_s20] sm:$0xff] %v245_v28  ;;  %248 = vst [vmem:[%s143_s20 + $0x8] sm:$0xff] %v246_v29 }
 0x22d PF: > { %s12_s9 = sadd.s32 1, %s349_s9  }
 0x22e   : > { %p9_p4 = scmp.ge.s32.totalorder %s12_s9, 4  }
 0x230   :  { %11 = sbr.rel (!%p9_p4) target bundleno = 1 (0x1), region = 58 }

// kernel: block_2in_forward.3
= control target key start
LH: loop header
LB: loop body
LE: loop exit
PB: predicated region body
PF: predicated region fallthrough
CT: control target
= control target key end

     0   :  { %s376_s9 = smov 0   ;;  %s403_s0 = inlined_call_operand.vmem [shape: bf16[2,72,64], index: 0, kind: input, shape index: {}]   ;;  %s404_s1 = inlined_call_operand.vmem [shape: bf16[8,72], index: 1, kind: input, shape index: {}]   ;;  %s405_s2 = inlined_call_operand.vmem [shape: f32[2,8,64], index: 2, kind: output, shape index: {}]  }
   0x1 LB: > { %s298_s10 = sadd.s32 4294967295, %s357_s9   ;;  %p302_p0 = scmp.ge.s32.totalorder %s357_s9, 1  ;;  %s357_s9 = sphi %s376_s9, %s12_s9  }
   0x2   : > { %p112_p1 = scmp.lt.s32.totalorder %s357_s9, 3 }
   0x4   : > { %p113_p2 = pnand %p302_p0, %p112_p1 }
   0x5   : > { %p133_p3 = scmp.lt.s32.totalorder (!%p113_p2), %s298_s10, 1  ;;  %v359_v0 = vmov (!%p113_p2), 0.0   ;;  %vm360_vm0 = vmmov (!%p113_p2), 0   ;;  %vm184_vm1 = vcmask (!%p113_p2), 1043456   ;;  %v143_v7 = vld [vmem:[%s404_s1] sm:$0xf] (!%p113_p2) }
   0x6   : > { %116 = sbr.rel (%p113_p2) target bundleno = 561 (0x231), region = 28  ;;  %319 = vmatprep.subr.bf16.mxu0 (!%p113_p2), %v359_v0  ;;  %329 = vmatprep.mubr.msk.bf16.mxu0 (!%p113_p2), %vm360_vm0, %v359_v0  ;;  %vm180_vm2 = vcmask (!%p113_p2), 588800   ;;  %vm228_vm3 = vcmask (!%p113_p2), 523264  }
   0xd   : > { %s407_s10 = smov (!%p133_p3, %s298_s10), 1 }
   0xe   : > { %s333_s11 = smul.u32 36, %s407_s10  ;;  %s304_s17 = sshll.u32 %s407_s10, 3 }
   0xf   : > { %s141_s20 = scalar_lea.vmem %s405_s2, %s304_s17 }
  0x10   : > { %s137_s14 = scalar_lea.vmem %s403_s0, %s333_s11 }
  0x11   : > { %v344_v1 = vld [vmem:[%s137_s14] sm:$0xff]   ;;  %v345_v2 = vld [vmem:[%s137_s14 + $0x8] sm:$0xff]   ;;  %v346_v3 = vld [vmem:[%s137_s14 + $0x10] sm:$0xff]  }
  0x12   : > { %320 = vmatpush3.bf16.msra.mxu0 %v344_v1  ;;  %v347_v4 = vld [vmem:[%s137_s14 + $0x18] sm:$0xff]   ;;  %v348_v5 = vld [vmem:[%s137_s14 + $0x20] ss:$0 sps:$4 sm:$0xff]  }
  0x13   : > { %321 = vmatprep.subr.bf16.mxu0 %v359_v0  ;;  %v186_v6 = vsel %vm184_vm1, %v348_v5, 0 }
  0x16   : > { %322 = vmatpush3.bf16.msra.mxu0 %v345_v2 }
  0x17   : > { %323 = vmatprep.subr.bf16.mxu0 %v359_v0 }
  0x1a   : > { %324 = vmatpush3.bf16.msra.mxu0 %v346_v3 }
  0x1b   : > { %325 = vmatprep.subr.bf16.mxu0 %v359_v0 }
  0x1e   : > { %326 = vmatpush3.bf16.msra.mxu0 %v347_v4 }
  0x1f   : > { %327 = vmatprep.subr.bf16.mxu0 %v359_v0 }
  0x22   : > { %328 = vmatpush3.bf16.msra.mxu0 %v186_v6 }
  0x25   : > { %330 = vmatmul.mubr.msk.bf16.vlgmr.msra.gmra.mrb[0].mxu0 %vm180_vm2, %v143_v7 }
  0xf8   : > { %v222_v8 = vpop.f32.mrb[0].mxu0 }
  0xf9   : > { %v331_v9 = vpop.f32.mrb[1].mxu0  ;;  %v229_v10 = vsel %vm228_vm3, %v222_v8, 0.0 }
  0xfa   : > { %230 = vadd.xlane.f32.xlu0 %v229_v10  ;;  %v225_v11 = vpop.f32.mrb[2].mxu0 }
  0xfb   : > { %v332_v12 = vpop.f32.mrb[3].mxu0 }
 0x187   : > { %v231_v13 = vpop.xlane.xlu0 %230 }
 0x188   : > { %v233_v14 = vmul.f32 0.015625, %v231_v13 }
 0x18a   : > { %v234_v15 = vsub.f32 %v222_v8, %v233_v14 }
 0x18c   : > { %v235_v16 = vmul.f32 %v234_v15, %v234_v15 }
 0x18e   : > { %v236_v17 = vsel %vm228_vm3, %v235_v16, 0.0 }
 0x18f   : > { %237 = vadd.xlane.f32.xlu0 %v236_v17 }
 0x21c   : > { %v238_v18 = vpop.xlane.xlu0 %237 }
 0x21d   : > { %v239_v19 = vmul.f32 0.015625, %v238_v18 }
 0x21f   : > { %v240_v20 = vadd.f32 1e-05, %v239_v19 }
 0x221   : > { %349 = vrsqrt.f32 %v240_v20 }
 0x22b   : > { %v350_v21 = vpop.eup %349 }
 0x22c   : > { %v242_v22 = vmul.f32 %v350_v21, %v234_v15 }
 0x22e   : > { %v243_v23 = vmax.f32 %v242_v22, 0.0 }
 0x230   : > { %244 = vst.msk [vmem:[%s141_s20] sm:$0xff] %vm228_vm3, %v243_v23 }
 0x231 PF: > { %s12_s9 = sadd.s32 1, %s357_s9  }
 0x232   : > { %p9_p4 = scmp.ge.s32.totalorder %s12_s9, 4  }
 0x234   :  { %11 = sbr.rel (!%p9_p4) target bundleno = 1 (0x1), region = 58 }

</bundles_post_ra>
